<compile_context>
chip_gen: v7x
topology: tpu7x:2x2x1
jax: 0.10.0
libtpu: 0.0.40
codegen_flags: <defaults>
</compile_context>

<pallas_src>
import functools

import jax
import jax.numpy as jnp
from jax import lax
from jax.experimental import pallas as pl
from jax.experimental.pallas import tpu as pltpu


def rnn_block_kernel(x_ref, win_ref, wrec_ref, b_ref, s0_ref,
                     spikes_ref, preds_ref, probs_ref,
                     h_ref, *, unroll):
    """Processes one (batch_block, time_block) tile of the recurrence."""
    t_blk, b_blk, d_in = x_ref.shape
    h_dim = wrec_ref.shape[1]

    # Load the initial spike state at the start of each batch block's sweep.
    @pl.when(pl.program_id(1) == 0)
    def _():
        h_ref[...] = s0_ref[...]

    # Phase 1: hoisted input projection for the whole time block -- one large
    # bf16 MXU GEMM, staged directly into the preds output block (no extra
    # scratch, no extra store+reload pass).
    x_flat = x_ref[...].reshape(t_blk * b_blk, d_in)
    xw = jnp.dot(x_flat, win_ref[...], preferred_element_type=jnp.float32)
    preds_ref[...] = (xw + b_ref[...]).reshape(t_blk, b_blk, h_dim)

    # Phase 2: serial recurrence over the time block.  Only a (B, H) x (H, H)
    # bf16 matmul + add + compare + cast sit on the dependency chain per step;
    # sigmoid/probs are handled in one bulk pass after the loop.
    def step(i, h_prev):
        rec = jnp.dot(h_prev, wrec_ref[...],
                      preferred_element_type=jnp.float32)
        pred = preds_ref[i] + rec                         # (B, H) f32
        preds_ref[i] = pred
        spike = (pred >= 0.0).astype(spikes_ref.dtype)    # == sigmoid(pred) >= 0.5
        spikes_ref[i] = spike
        return spike                                      # bf16 carry

    h_last = lax.fori_loop(0, t_blk, step, h_ref[...], unroll=unroll)
    h_ref[...] = h_last

    # Bulk sigmoid (EUP) off the serial critical path; reads the preds block
    # already resident in VMEM and fills the probs output block.
    probs_ref[...] = jax.nn.sigmoid(preds_ref[...])


def _vmem_capacity_bytes():
    """Best-effort per-core VMEM capacity query with a conservative fallback."""
    try:
        info = pltpu.get_tpu_info()
        for name in ("vmem_capacity_bytes", "vmem_bytes"):
            v = getattr(info, name, None)
            if v:
                return int(v)
    except Exception:
        pass
    return 64 * 1024 * 1024   # conservative (v7x per-TensorCore VMEM)


def _pick_time_block(T, b_blk, D, H, vmem_limit_bytes):
    """Largest divisor of T whose per-block VMEM footprint fits the limit."""
    # Double-buffered constants (W_in bf16, W_rec bf16, bias f32, s0 bf16)
    # plus the persistent carried-state scratch.
    fixed = 2 * (D * H * 2 + H * H * 2 + H * 4 + b_blk * H * 2) + b_blk * H * 2
    headroom = 2 << 20                 # compiler-internal scratch, semaphores
    budget = max(vmem_limit_bytes - fixed - headroom, 1)
    # Double-buffered per-time-block traffic: x (bf16) in; spikes (bf16),
    # preds (f32), probs (f32) out.
    per_step = 2 * b_blk * (2 * D + (2 + 4 + 4) * H)
    cap = max(1, min(T, budget // max(per_step, 1)))
    for d in range(int(cap), 0, -1):
        if T % d == 0:
            return d
    return 1


def rnn_layer(inputs, state, w_in, w_rec, bias, *, t_blk=None):
    """Pallas equivalent of RNNLayer.forward.

    inputs: [T, B, D] f32 (time-major, like torch `inputs.unbind(0)`)
    state:  {'spike': [B, H]}
    returns (out, new_state) with
      out = {'spikes': [T+1, B, H] bf16 (binary, exact), 'preds': [T, B, H] f32,
             'probs': [T, B, H] f32}
      new_state = {'spike': [B, H]} in the input state's dtype.
    """
    T, B, D = inputs.shape
    H = w_in.shape[1]
    # NOTE: B should be a multiple of 8 and H a multiple of 128 for clean
    # (sublane, lane) layout; pad in the caller otherwise.

    # Split the batch so the "parallel" grid axis can shard across the two
    # TensorCores on v7x; with nb == 1 the second core would sit idle.
    if B >= 16 and (B // 2) % 8 == 0:
        b_blk = B // 2
    else:
        b_blk = B
    nb = B // b_blk

    vmem_cap = _vmem_capacity_bytes()
    vmem_limit = int(min(max(vmem_cap * 3 // 4, 16 << 20), 100 << 20))

    if t_blk is None:
        t_blk = _pick_time_block(T, b_blk, D, H, vmem_limit)
    assert T % t_blk == 0
    nt = T // t_blk

    # Bounded unroll: keep live (b_blk, H) f32 values well inside the 64-vreg
    # file (full unroll only for small blocks).
    vregs_per_val = max(1, (b_blk * H) // (8 * 128))
    unroll = int(max(1, min(8, t_blk, 48 // (3 * vregs_per_val))))

    x_bf = inputs.astype(jnp.bfloat16)             # halves x DMA, feeds bf16 MXU
    win_bf = w_in.astype(jnp.bfloat16)
    wrec_bf = w_rec.astype(jnp.bfloat16)
    s0 = state['spike'].astype(jnp.bfloat16)       # binary -> exact in bf16
    bias2d = bias.reshape(1, H).astype(jnp.float32)

    out_shapes = (
        jax.ShapeDtypeStruct((T, B, H), jnp.bfloat16),   # spikes (binary)
        jax.ShapeDtypeStruct((T, B, H), jnp.float32),    # preds
        jax.ShapeDtypeStruct((T, B, H), jnp.float32),    # probs
    )

    grid_spec = pltpu.PrefetchScalarGridSpec(
        num_scalar_prefetch=0,
        grid=(nb, nt),
        in_specs=[
            pl.BlockSpec((t_blk, b_blk, D), lambda b, t: (t, b, 0)),   # x block
            pl.BlockSpec((D, H), lambda b, t: (0, 0)),                 # W_in bf16
            pl.BlockSpec((H, H), lambda b, t: (0, 0)),                 # W_rec bf16
            pl.BlockSpec((1, H), lambda b, t: (0, 0)),                 # bias
            pl.BlockSpec((b_blk, H), lambda b, t: (b, 0)),             # s0
        ],
        out_specs=[
            pl.BlockSpec((t_blk, b_blk, H), lambda b, t: (t, b, 0)),
            pl.BlockSpec((t_blk, b_blk, H), lambda b, t: (t, b, 0)),
            pl.BlockSpec((t_blk, b_blk, H), lambda b, t: (t, b, 0)),
        ],
        scratch_shapes=[
            pltpu.VMEM((b_blk, H), jnp.bfloat16),        # carried spike state
        ],
    )

    spikes_t, preds_t, probs_t = pl.pallas_call(
        functools.partial(rnn_block_kernel, unroll=unroll),
        out_shape=out_shapes,
        grid_spec=grid_spec,
        compiler_params=pltpu.CompilerParams(
            # time is a true recurrence -> arbitrary; batch blocks are
            # independent -> parallel (grid order keeps time innermost, which
            # the carried h_ref scratch relies on).
            dimension_semantics=("parallel", "arbitrary"),
            vmem_limit_bytes=vmem_limit,
        ),
    )(x_bf, win_bf, wrec_bf, bias2d, s0)

    # torch.stack([state['spike']] + per-step spikes) -> length T+1.
    # TODO(synk): fold the s0 row into the kernel's spikes output (shifted
    #             element offset on the time axis) to drop this extra HBM pass.
    spikes = jnp.concatenate([s0[None], spikes_t], axis=0)
    out = {'spikes': spikes, 'preds': preds_t, 'probs': probs_t}
    new_state = {'spike': spikes_t[-1].astype(state['spike'].dtype)}
    return out, new_state


def rnn_layer_ref(inputs, state, w_in, w_rec, bias):
    """Pure-JAX reference mirroring the PyTorch loop with the kernel's
    numerics (bf16 matmul inputs, f32 accumulation)."""
    x_bf = inputs.astype(jnp.bfloat16)
    win_bf = w_in.astype(jnp.bfloat16)
    wrec_bf = w_rec.astype(jnp.bfloat16)
    h = state['spike'].astype(jnp.bfloat16)
    spikes = [h.astype(jnp.float32)]
    preds, probs = [], []
    for t in range(inputs.shape[0]):
        xwb = jnp.dot(x_bf[t], win_bf, preferred_element_type=jnp.float32) + bias
        rec = jnp.dot(h, wrec_bf, preferred_element_type=jnp.float32)
        pred = xwb + rec
        prob = jax.nn.sigmoid(pred)
        h = (pred >= 0.0).astype(jnp.bfloat16)   # == (prob >= 0.5)
        spikes.append(h.astype(jnp.float32))
        preds.append(pred)
        probs.append(prob)
    return ({'spikes': jnp.stack(spikes), 'preds': jnp.stack(preds),
             'probs': jnp.stack(probs)},
            {'spike': h.astype(jnp.float32)})


if __name__ == "__main__":
    T, B, D, H = 8, 8, 32, 128

    key = jax.random.PRNGKey(0)
    k_x, k_s, k_win, k_wrec, k_b = jax.random.split(key, 5)

    inputs = jax.random.normal(k_x, (T, B, D), dtype=jnp.float32)
    init_spike = (jax.random.uniform(k_s, (B, H)) > 0.5).astype(jnp.float32)
    state = {'spike': init_spike}

    w_in = jax.random.normal(k_win, (D, H), dtype=jnp.float32) * 0.1
    w_rec = jax.random.normal(k_wrec, (H, H), dtype=jnp.float32) * 0.1
    bias = jax.random.normal(k_b, (H,), dtype=jnp.float32) * 0.1

    out, new_state = rnn_layer(inputs, state, w_in, w_rec, bias)
    jax.block_until_ready((out, new_state))

    out_ref, state_ref = rnn_layer_ref(inputs, state, w_in, w_rec, bias)

    assert out['spikes'].shape == (T + 1, B, H)
    assert out['preds'].shape == (T, B, H)
    assert out['probs'].shape == (T, B, H)
    assert new_state['spike'].dtype == state['spike'].dtype
    assert jnp.allclose(out['preds'], out_ref['preds'], atol=5e-3)
    assert jnp.allclose(out['probs'], out_ref['probs'], atol=2e-3)
    assert jnp.array_equal(out['spikes'].astype(jnp.float32),
                           out_ref['spikes'])
    assert jnp.array_equal(new_state['spike'].astype(jnp.float32),
                           state_ref['spike'])

    print("KERNEL_OK")
</pallas_src>

<mosaic_0001>
module attributes {stable_mosaic.version = 11 : i64} {
  func.func @rnn_block_kernel(%arg0: i32, %arg1: i32, %arg2: memref<8x8x32xbf16, #tpu.memory_space<vmem>>, %arg3: memref<32x128xbf16, #tpu.memory_space<vmem>>, %arg4: memref<128x128xbf16, #tpu.memory_space<vmem>>, %arg5: memref<1x128xf32, #tpu.memory_space<vmem>>, %arg6: memref<8x128xbf16, #tpu.memory_space<vmem>>, %arg7: memref<8x8x128xbf16, #tpu.memory_space<vmem>>, %arg8: memref<8x8x128xf32, #tpu.memory_space<vmem>>, %arg9: memref<8x8x128xf32, #tpu.memory_space<vmem>>, %arg10: memref<8x128xbf16, #tpu.memory_space<vmem>>) attributes {dimension_semantics = [#tpu.dimension_semantics<parallel>, #tpu.dimension_semantics<arbitrary>], iteration_bounds = array<i64: 1, 1>, scalar_prefetch = 0 : i64, scratch_operands = 1 : i64, tpu.core_type = #tpu.core_type<tc>, window_params = [{transform_indices = @transform_0, window_bounds = array<i64: 8, 8, 32>}, {pipeline_mode = #tpu.pipeline_mode<synchronous>, transform_indices = @transform_1, window_bounds = array<i64: 32, 128>}, {pipeline_mode = #tpu.pipeline_mode<synchronous>, transform_indices = @transform_2, window_bounds = array<i64: 128, 128>}, {pipeline_mode = #tpu.pipeline_mode<synchronous>, transform_indices = @transform_3, window_bounds = array<i64: 1, 128>}, {transform_indices = @transform_4, window_bounds = array<i64: 8, 128>}, {transform_indices = @transform_5, window_bounds = array<i64: 8, 8, 128>}, {transform_indices = @transform_6, window_bounds = array<i64: 8, 8, 128>}, {transform_indices = @transform_7, window_bounds = array<i64: 8, 8, 128>}]} {
    %c0_i32 = arith.constant 0 : i32
    %0 = arith.cmpi eq, %arg1, %c0_i32 : i32
    %1 = arith.extui %0 : i1 to i32
    %c0_i32_0 = arith.constant 0 : i32
    %2 = arith.cmpi ne, %1, %c0_i32_0 : i32
    scf.if %2 {
      %c0_102 = arith.constant 0 : index
      %c0_103 = arith.constant 0 : index
      %173 = vector.load %arg6[%c0_102, %c0_103] : memref<8x128xbf16, #tpu.memory_space<vmem>>, vector<8x128xbf16>
      %c0_104 = arith.constant 0 : index
      %c0_105 = arith.constant 0 : index
      %174 = vector.load %arg10[%c0_104, %c0_105] : memref<8x128xbf16, #tpu.memory_space<vmem>>, vector<8x128xbf16>
      tpu.vector_store %arg10[%c0_104, %c0_105], %173 {strides = array<i32>} : memref<8x128xbf16, #tpu.memory_space<vmem>>, vector<8x128xbf16>,
    } else {
    }
    %c0 = arith.constant 0 : index
    %c0_1 = arith.constant 0 : index
    %c0_2 = arith.constant 0 : index
    %3 = vector.load %arg2[%c0, %c0_1, %c0_2] : memref<8x8x32xbf16, #tpu.memory_space<vmem>>, vector<8x8x32xbf16>
    %4 = vector.shape_cast %3 : vector<8x8x32xbf16> to vector<64x32xbf16>
    %c0_3 = arith.constant 0 : index
    %c0_4 = arith.constant 0 : index
    %5 = vector.load %arg3[%c0_3, %c0_4] : memref<32x128xbf16, #tpu.memory_space<vmem>>, vector<32x128xbf16>
    %cst = arith.constant dense<0.000000e+00> : vector<64x128xf32>
    %6 = tpu.matmul %4, %5, %cst {dimension_numbers = #tpu.dot_dimension_numbers<[1], [0], [0], [1], [0, 0, 1, 1], [], []>} : vector<64x32xbf16>, vector<32x128xbf16>, vector<64x128xf32> -> vector<64x128xf32>
    %c0_5 = arith.constant 0 : index
    %c0_6 = arith.constant 0 : index
    %7 = vector.load %arg5[%c0_5, %c0_6] : memref<1x128xf32, #tpu.memory_space<vmem>>, vector<1x128xf32>
    %8 = vector.broadcast %7 : vector<1x128xf32> to vector<64x128xf32>
    %9 = arith.addf %6, %8 : vector<64x128xf32>
    %10 = vector.shape_cast %9 : vector<64x128xf32> to vector<8x8x128xf32>
    %c0_7 = arith.constant 0 : index
    %c0_8 = arith.constant 0 : index
    %c0_9 = arith.constant 0 : index
    %11 = vector.load %arg8[%c0_7, %c0_8, %c0_9] : memref<8x8x128xf32, #tpu.memory_space<vmem>>, vector<8x8x128xf32>
    tpu.vector_store %arg8[%c0_7, %c0_8, %c0_9], %10 {strides = array<i32>} : memref<8x8x128xf32, #tpu.memory_space<vmem>>, vector<8x8x128xf32>,
    %c0_10 = arith.constant 0 : index
    %c0_11 = arith.constant 0 : index
    %12 = vector.load %arg10[%c0_10, %c0_11] : memref<8x128xbf16, #tpu.memory_space<vmem>>, vector<8x128xbf16>
    %c0_i32_12 = arith.constant 0 : i32
    %c0_13 = arith.constant 0 : index
    %c0_14 = arith.constant 0 : index
    %13 = vector.load %arg4[%c0_13, %c0_14] : memref<128x128xbf16, #tpu.memory_space<vmem>>, vector<128x128xbf16>
    %cst_15 = arith.constant dense<0.000000e+00> : vector<8x128xf32>
    %14 = tpu.matmul %12, %13, %cst_15 {dimension_numbers = #tpu.dot_dimension_numbers<[1], [0], [0], [1], [0, 0, 1, 1], [], []>} : vector<8x128xbf16>, vector<128x128xbf16>, vector<8x128xf32> -> vector<8x128xf32>
    %15 = arith.index_cast %c0_i32_12 : i32 to index
    %c0_16 = arith.constant 0 : index
    %c0_17 = arith.constant 0 : index
    %16 = vector.load %arg8[%15, %c0_16, %c0_17] : memref<8x8x128xf32, #tpu.memory_space<vmem>>, vector<1x8x128xf32>
    %17 = vector.shape_cast %16 : vector<1x8x128xf32> to vector<8x128xf32>
    %18 = arith.addf %17, %14 : vector<8x128xf32>
    %19 = arith.index_cast %c0_i32_12 : i32 to index
    %c0_18 = arith.constant 0 : index
    %c0_19 = arith.constant 0 : index
    %20 = vector.load %arg8[%19, %c0_18, %c0_19] : memref<8x8x128xf32, #tpu.memory_space<vmem>>, vector<1x8x128xf32>
    %21 = vector.shape_cast %20 : vector<1x8x128xf32> to vector<8x128xf32>
    %22 = vector.shape_cast %18 : vector<8x128xf32> to vector<1x8x128xf32>
    tpu.vector_store %arg8[%19, %c0_18, %c0_19], %22 {strides = array<i32>} : memref<8x8x128xf32, #tpu.memory_space<vmem>>, vector<1x8x128xf32>,
    %cst_20 = arith.constant 0.000000e+00 : f32
    %23 = vector.broadcast %cst_20 : f32 to vector<8x128xf32>
    %24 = arith.cmpf oge, %18, %23 : vector<8x128xf32>
    %25 = arith.extui %24 : vector<8x128xi1> to vector<8x128xi32>
    %26 = arith.sitofp %25 : vector<8x128xi32> to vector<8x128xf32>
    %27 = arith.truncf %26 : vector<8x128xf32> to vector<8x128xbf16>
    %28 = arith.index_cast %c0_i32_12 : i32 to index
    %c0_21 = arith.constant 0 : index
    %c0_22 = arith.constant 0 : index
    %29 = vector.load %arg7[%28, %c0_21, %c0_22] : memref<8x8x128xbf16, #tpu.memory_space<vmem>>, vector<1x8x128xbf16>
    %30 = vector.shape_cast %29 : vector<1x8x128xbf16> to vector<8x128xbf16>
    %31 = vector.shape_cast %27 : vector<8x128xbf16> to vector<1x8x128xbf16>
    tpu.vector_store %arg7[%28, %c0_21, %c0_22], %31 {strides = array<i32>} : memref<8x8x128xbf16, #tpu.memory_space<vmem>>, vector<1x8x128xbf16>,
    %c1_i32 = arith.constant 1 : i32
    %c0_23 = arith.constant 0 : index
    %c0_24 = arith.constant 0 : index
    %32 = vector.load %arg4[%c0_23, %c0_24] : memref<128x128xbf16, #tpu.memory_space<vmem>>, vector<128x128xbf16>
    %cst_25 = arith.constant dense<0.000000e+00> : vector<8x128xf32>
    %33 = tpu.matmul %27, %32, %cst_25 {dimension_numbers = #tpu.dot_dimension_numbers<[1], [0], [0], [1], [0, 0, 1, 1], [], []>} : vector<8x128xbf16>, vector<128x128xbf16>, vector<8x128xf32> -> vector<8x128xf32>
    %34 = arith.index_cast %c1_i32 : i32 to index
    %c0_26 = arith.constant 0 : index
    %c0_27 = arith.constant 0 : index
    %35 = vector.load %arg8[%34, %c0_26, %c0_27] : memref<8x8x128xf32, #tpu.memory_space<vmem>>, vector<1x8x128xf32>
    %36 = vector.shape_cast %35 : vector<1x8x128xf32> to vector<8x128xf32>
    %37 = arith.addf %36, %33 : vector<8x128xf32>
    %38 = arith.index_cast %c1_i32 : i32 to index
    %c0_28 = arith.constant 0 : index
    %c0_29 = arith.constant 0 : index
    %39 = vector.load %arg8[%38, %c0_28, %c0_29] : memref<8x8x128xf32, #tpu.memory_space<vmem>>, vector<1x8x128xf32>
    %40 = vector.shape_cast %39 : vector<1x8x128xf32> to vector<8x128xf32>
    %41 = vector.shape_cast %37 : vector<8x128xf32> to vector<1x8x128xf32>
    tpu.vector_store %arg8[%38, %c0_28, %c0_29], %41 {strides = array<i32>} : memref<8x8x128xf32, #tpu.memory_space<vmem>>, vector<1x8x128xf32>,
    %cst_30 = arith.constant 0.000000e+00 : f32
    %42 = vector.broadcast %cst_30 : f32 to vector<8x128xf32>
    %43 = arith.cmpf oge, %37, %42 : vector<8x128xf32>
    %44 = arith.extui %43 : vector<8x128xi1> to vector<8x128xi32>
    %45 = arith.sitofp %44 : vector<8x128xi32> to vector<8x128xf32>
    %46 = arith.truncf %45 : vector<8x128xf32> to vector<8x128xbf16>
    %47 = arith.index_cast %c1_i32 : i32 to index
    %c0_31 = arith.constant 0 : index
    %c0_32 = arith.constant 0 : index
    %48 = vector.load %arg7[%47, %c0_31, %c0_32] : memref<8x8x128xbf16, #tpu.memory_space<vmem>>, vector<1x8x128xbf16>
    %49 = vector.shape_cast %48 : vector<1x8x128xbf16> to vector<8x128xbf16>
    %50 = vector.shape_cast %46 : vector<8x128xbf16> to vector<1x8x128xbf16>
    tpu.vector_store %arg7[%47, %c0_31, %c0_32], %50 {strides = array<i32>} : memref<8x8x128xbf16, #tpu.memory_space<vmem>>, vector<1x8x128xbf16>,
    %c2_i32 = arith.constant 2 : i32
    %c0_33 = arith.constant 0 : index
    %c0_34 = arith.constant 0 : index
    %51 = vector.load %arg4[%c0_33, %c0_34] : memref<128x128xbf16, #tpu.memory_space<vmem>>, vector<128x128xbf16>
    %cst_35 = arith.constant dense<0.000000e+00> : vector<8x128xf32>
    %52 = tpu.matmul %46, %51, %cst_35 {dimension_numbers = #tpu.dot_dimension_numbers<[1], [0], [0], [1], [0, 0, 1, 1], [], []>} : vector<8x128xbf16>, vector<128x128xbf16>, vector<8x128xf32> -> vector<8x128xf32>
    %53 = arith.index_cast %c2_i32 : i32 to index
    %c0_36 = arith.constant 0 : index
    %c0_37 = arith.constant 0 : index
    %54 = vector.load %arg8[%53, %c0_36, %c0_37] : memref<8x8x128xf32, #tpu.memory_space<vmem>>, vector<1x8x128xf32>
    %55 = vector.shape_cast %54 : vector<1x8x128xf32> to vector<8x128xf32>
    %56 = arith.addf %55, %52 : vector<8x128xf32>
    %57 = arith.index_cast %c2_i32 : i32 to index
    %c0_38 = arith.constant 0 : index
    %c0_39 = arith.constant 0 : index
    %58 = vector.load %arg8[%57, %c0_38, %c0_39] : memref<8x8x128xf32, #tpu.memory_space<vmem>>, vector<1x8x128xf32>
    %59 = vector.shape_cast %58 : vector<1x8x128xf32> to vector<8x128xf32>
    %60 = vector.shape_cast %56 : vector<8x128xf32> to vector<1x8x128xf32>
    tpu.vector_store %arg8[%57, %c0_38, %c0_39], %60 {strides = array<i32>} : memref<8x8x128xf32, #tpu.memory_space<vmem>>, vector<1x8x128xf32>,
    %cst_40 = arith.constant 0.000000e+00 : f32
    %61 = vector.broadcast %cst_40 : f32 to vector<8x128xf32>
    %62 = arith.cmpf oge, %56, %61 : vector<8x128xf32>
    %63 = arith.extui %62 : vector<8x128xi1> to vector<8x128xi32>
    %64 = arith.sitofp %63 : vector<8x128xi32> to vector<8x128xf32>
    %65 = arith.truncf %64 : vector<8x128xf32> to vector<8x128xbf16>
    %66 = arith.index_cast %c2_i32 : i32 to index
    %c0_41 = arith.constant 0 : index
    %c0_42 = arith.constant 0 : index
    %67 = vector.load %arg7[%66, %c0_41, %c0_42] : memref<8x8x128xbf16, #tpu.memory_space<vmem>>, vector<1x8x128xbf16>
    %68 = vector.shape_cast %67 : vector<1x8x128xbf16> to vector<8x128xbf16>
    %69 = vector.shape_cast %65 : vector<8x128xbf16> to vector<1x8x128xbf16>
    tpu.vector_store %arg7[%66, %c0_41, %c0_42], %69 {strides = array<i32>} : memref<8x8x128xbf16, #tpu.memory_space<vmem>>, vector<1x8x128xbf16>,
    %c3_i32 = arith.constant 3 : i32
    %c0_43 = arith.constant 0 : index
    %c0_44 = arith.constant 0 : index
    %70 = vector.load %arg4[%c0_43, %c0_44] : memref<128x128xbf16, #tpu.memory_space<vmem>>, vector<128x128xbf16>
    %cst_45 = arith.constant dense<0.000000e+00> : vector<8x128xf32>
    %71 = tpu.matmul %65, %70, %cst_45 {dimension_numbers = #tpu.dot_dimension_numbers<[1], [0], [0], [1], [0, 0, 1, 1], [], []>} : vector<8x128xbf16>, vector<128x128xbf16>, vector<8x128xf32> -> vector<8x128xf32>
    %72 = arith.index_cast %c3_i32 : i32 to index
    %c0_46 = arith.constant 0 : index
    %c0_47 = arith.constant 0 : index
    %73 = vector.load %arg8[%72, %c0_46, %c0_47] : memref<8x8x128xf32, #tpu.memory_space<vmem>>, vector<1x8x128xf32>
    %74 = vector.shape_cast %73 : vector<1x8x128xf32> to vector<8x128xf32>
    %75 = arith.addf %74, %71 : vector<8x128xf32>
    %76 = arith.index_cast %c3_i32 : i32 to index
    %c0_48 = arith.constant 0 : index
    %c0_49 = arith.constant 0 : index
    %77 = vector.load %arg8[%76, %c0_48, %c0_49] : memref<8x8x128xf32, #tpu.memory_space<vmem>>, vector<1x8x128xf32>
    %78 = vector.shape_cast %77 : vector<1x8x128xf32> to vector<8x128xf32>
    %79 = vector.shape_cast %75 : vector<8x128xf32> to vector<1x8x128xf32>
    tpu.vector_store %arg8[%76, %c0_48, %c0_49], %79 {strides = array<i32>} : memref<8x8x128xf32, #tpu.memory_space<vmem>>, vector<1x8x128xf32>,
    %cst_50 = arith.constant 0.000000e+00 : f32
    %80 = vector.broadcast %cst_50 : f32 to vector<8x128xf32>
    %81 = arith.cmpf oge, %75, %80 : vector<8x128xf32>
    %82 = arith.extui %81 : vector<8x128xi1> to vector<8x128xi32>
    %83 = arith.sitofp %82 : vector<8x128xi32> to vector<8x128xf32>
    %84 = arith.truncf %83 : vector<8x128xf32> to vector<8x128xbf16>
    %85 = arith.index_cast %c3_i32 : i32 to index
    %c0_51 = arith.constant 0 : index
    %c0_52 = arith.constant 0 : index
    %86 = vector.load %arg7[%85, %c0_51, %c0_52] : memref<8x8x128xbf16, #tpu.memory_space<vmem>>, vector<1x8x128xbf16>
    %87 = vector.shape_cast %86 : vector<1x8x128xbf16> to vector<8x128xbf16>
    %88 = vector.shape_cast %84 : vector<8x128xbf16> to vector<1x8x128xbf16>
    tpu.vector_store %arg7[%85, %c0_51, %c0_52], %88 {strides = array<i32>} : memref<8x8x128xbf16, #tpu.memory_space<vmem>>, vector<1x8x128xbf16>,
    %c4_i32 = arith.constant 4 : i32
    %c0_53 = arith.constant 0 : index
    %c0_54 = arith.constant 0 : index
    %89 = vector.load %arg4[%c0_53, %c0_54] : memref<128x128xbf16, #tpu.memory_space<vmem>>, vector<128x128xbf16>
    %cst_55 = arith.constant dense<0.000000e+00> : vector<8x128xf32>
    %90 = tpu.matmul %84, %89, %cst_55 {dimension_numbers = #tpu.dot_dimension_numbers<[1], [0], [0], [1], [0, 0, 1, 1], [], []>} : vector<8x128xbf16>, vector<128x128xbf16>, vector<8x128xf32> -> vector<8x128xf32>
    %91 = arith.index_cast %c4_i32 : i32 to index
    %c0_56 = arith.constant 0 : index
    %c0_57 = arith.constant 0 : index
    %92 = vector.load %arg8[%91, %c0_56, %c0_57] : memref<8x8x128xf32, #tpu.memory_space<vmem>>, vector<1x8x128xf32>
    %93 = vector.shape_cast %92 : vector<1x8x128xf32> to vector<8x128xf32>
    %94 = arith.addf %93, %90 : vector<8x128xf32>
    %95 = arith.index_cast %c4_i32 : i32 to index
    %c0_58 = arith.constant 0 : index
    %c0_59 = arith.constant 0 : index
    %96 = vector.load %arg8[%95, %c0_58, %c0_59] : memref<8x8x128xf32, #tpu.memory_space<vmem>>, vector<1x8x128xf32>
    %97 = vector.shape_cast %96 : vector<1x8x128xf32> to vector<8x128xf32>
    %98 = vector.shape_cast %94 : vector<8x128xf32> to vector<1x8x128xf32>
    tpu.vector_store %arg8[%95, %c0_58, %c0_59], %98 {strides = array<i32>} : memref<8x8x128xf32, #tpu.memory_space<vmem>>, vector<1x8x128xf32>,
    %cst_60 = arith.constant 0.000000e+00 : f32
    %99 = vector.broadcast %cst_60 : f32 to vector<8x128xf32>
    %100 = arith.cmpf oge, %94, %99 : vector<8x128xf32>
    %101 = arith.extui %100 : vector<8x128xi1> to vector<8x128xi32>
    %102 = arith.sitofp %101 : vector<8x128xi32> to vector<8x128xf32>
    %103 = arith.truncf %102 : vector<8x128xf32> to vector<8x128xbf16>
    %104 = arith.index_cast %c4_i32 : i32 to index
    %c0_61 = arith.constant 0 : index
    %c0_62 = arith.constant 0 : index
    %105 = vector.load %arg7[%104, %c0_61, %c0_62] : memref<8x8x128xbf16, #tpu.memory_space<vmem>>, vector<1x8x128xbf16>
    %106 = vector.shape_cast %105 : vector<1x8x128xbf16> to vector<8x128xbf16>
    %107 = vector.shape_cast %103 : vector<8x128xbf16> to vector<1x8x128xbf16>
    tpu.vector_store %arg7[%104, %c0_61, %c0_62], %107 {strides = array<i32>} : memref<8x8x128xbf16, #tpu.memory_space<vmem>>, vector<1x8x128xbf16>,
    %c5_i32 = arith.constant 5 : i32
    %c0_63 = arith.constant 0 : index
    %c0_64 = arith.constant 0 : index
    %108 = vector.load %arg4[%c0_63, %c0_64] : memref<128x128xbf16, #tpu.memory_space<vmem>>, vector<128x128xbf16>
    %cst_65 = arith.constant dense<0.000000e+00> : vector<8x128xf32>
    %109 = tpu.matmul %103, %108, %cst_65 {dimension_numbers = #tpu.dot_dimension_numbers<[1], [0], [0], [1], [0, 0, 1, 1], [], []>} : vector<8x128xbf16>, vector<128x128xbf16>, vector<8x128xf32> -> vector<8x128xf32>
    %110 = arith.index_cast %c5_i32 : i32 to index
    %c0_66 = arith.constant 0 : index
    %c0_67 = arith.constant 0 : index
    %111 = vector.load %arg8[%110, %c0_66, %c0_67] : memref<8x8x128xf32, #tpu.memory_space<vmem>>, vector<1x8x128xf32>
    %112 = vector.shape_cast %111 : vector<1x8x128xf32> to vector<8x128xf32>
    %113 = arith.addf %112, %109 : vector<8x128xf32>
    %114 = arith.index_cast %c5_i32 : i32 to index
    %c0_68 = arith.constant 0 : index
    %c0_69 = arith.constant 0 : index
    %115 = vector.load %arg8[%114, %c0_68, %c0_69] : memref<8x8x128xf32, #tpu.memory_space<vmem>>, vector<1x8x128xf32>
    %116 = vector.shape_cast %115 : vector<1x8x128xf32> to vector<8x128xf32>
    %117 = vector.shape_cast %113 : vector<8x128xf32> to vector<1x8x128xf32>
    tpu.vector_store %arg8[%114, %c0_68, %c0_69], %117 {strides = array<i32>} : memref<8x8x128xf32, #tpu.memory_space<vmem>>, vector<1x8x128xf32>,
    %cst_70 = arith.constant 0.000000e+00 : f32
    %118 = vector.broadcast %cst_70 : f32 to vector<8x128xf32>
    %119 = arith.cmpf oge, %113, %118 : vector<8x128xf32>
    %120 = arith.extui %119 : vector<8x128xi1> to vector<8x128xi32>
    %121 = arith.sitofp %120 : vector<8x128xi32> to vector<8x128xf32>
    %122 = arith.truncf %121 : vector<8x128xf32> to vector<8x128xbf16>
    %123 = arith.index_cast %c5_i32 : i32 to index
    %c0_71 = arith.constant 0 : index
    %c0_72 = arith.constant 0 : index
    %124 = vector.load %arg7[%123, %c0_71, %c0_72] : memref<8x8x128xbf16, #tpu.memory_space<vmem>>, vector<1x8x128xbf16>
    %125 = vector.shape_cast %124 : vector<1x8x128xbf16> to vector<8x128xbf16>
    %126 = vector.shape_cast %122 : vector<8x128xbf16> to vector<1x8x128xbf16>
    tpu.vector_store %arg7[%123, %c0_71, %c0_72], %126 {strides = array<i32>} : memref<8x8x128xbf16, #tpu.memory_space<vmem>>, vector<1x8x128xbf16>,
    %c6_i32 = arith.constant 6 : i32
    %c0_73 = arith.constant 0 : index
    %c0_74 = arith.constant 0 : index
    %127 = vector.load %arg4[%c0_73, %c0_74] : memref<128x128xbf16, #tpu.memory_space<vmem>>, vector<128x128xbf16>
    %cst_75 = arith.constant dense<0.000000e+00> : vector<8x128xf32>
    %128 = tpu.matmul %122, %127, %cst_75 {dimension_numbers = #tpu.dot_dimension_numbers<[1], [0], [0], [1], [0, 0, 1, 1], [], []>} : vector<8x128xbf16>, vector<128x128xbf16>, vector<8x128xf32> -> vector<8x128xf32>
    %129 = arith.index_cast %c6_i32 : i32 to index
    %c0_76 = arith.constant 0 : index
    %c0_77 = arith.constant 0 : index
    %130 = vector.load %arg8[%129, %c0_76, %c0_77] : memref<8x8x128xf32, #tpu.memory_space<vmem>>, vector<1x8x128xf32>
    %131 = vector.shape_cast %130 : vector<1x8x128xf32> to vector<8x128xf32>
    %132 = arith.addf %131, %128 : vector<8x128xf32>
    %133 = arith.index_cast %c6_i32 : i32 to index
    %c0_78 = arith.constant 0 : index
    %c0_79 = arith.constant 0 : index
    %134 = vector.load %arg8[%133, %c0_78, %c0_79] : memref<8x8x128xf32, #tpu.memory_space<vmem>>, vector<1x8x128xf32>
    %135 = vector.shape_cast %134 : vector<1x8x128xf32> to vector<8x128xf32>
    %136 = vector.shape_cast %132 : vector<8x128xf32> to vector<1x8x128xf32>
    tpu.vector_store %arg8[%133, %c0_78, %c0_79], %136 {strides = array<i32>} : memref<8x8x128xf32, #tpu.memory_space<vmem>>, vector<1x8x128xf32>,
    %cst_80 = arith.constant 0.000000e+00 : f32
    %137 = vector.broadcast %cst_80 : f32 to vector<8x128xf32>
    %138 = arith.cmpf oge, %132, %137 : vector<8x128xf32>
    %139 = arith.extui %138 : vector<8x128xi1> to vector<8x128xi32>
    %140 = arith.sitofp %139 : vector<8x128xi32> to vector<8x128xf32>
    %141 = arith.truncf %140 : vector<8x128xf32> to vector<8x128xbf16>
    %142 = arith.index_cast %c6_i32 : i32 to index
    %c0_81 = arith.constant 0 : index
    %c0_82 = arith.constant 0 : index
    %143 = vector.load %arg7[%142, %c0_81, %c0_82] : memref<8x8x128xbf16, #tpu.memory_space<vmem>>, vector<1x8x128xbf16>
    %144 = vector.shape_cast %143 : vector<1x8x128xbf16> to vector<8x128xbf16>
    %145 = vector.shape_cast %141 : vector<8x128xbf16> to vector<1x8x128xbf16>
    tpu.vector_store %arg7[%142, %c0_81, %c0_82], %145 {strides = array<i32>} : memref<8x8x128xbf16, #tpu.memory_space<vmem>>, vector<1x8x128xbf16>,
    %c7_i32 = arith.constant 7 : i32
    %c0_83 = arith.constant 0 : index
    %c0_84 = arith.constant 0 : index
    %146 = vector.load %arg4[%c0_83, %c0_84] : memref<128x128xbf16, #tpu.memory_space<vmem>>, vector<128x128xbf16>
    %cst_85 = arith.constant dense<0.000000e+00> : vector<8x128xf32>
    %147 = tpu.matmul %141, %146, %cst_85 {dimension_numbers = #tpu.dot_dimension_numbers<[1], [0], [0], [1], [0, 0, 1, 1], [], []>} : vector<8x128xbf16>, vector<128x128xbf16>, vector<8x128xf32> -> vector<8x128xf32>
    %148 = arith.index_cast %c7_i32 : i32 to index
    %c0_86 = arith.constant 0 : index
    %c0_87 = arith.constant 0 : index
    %149 = vector.load %arg8[%148, %c0_86, %c0_87] : memref<8x8x128xf32, #tpu.memory_space<vmem>>, vector<1x8x128xf32>
    %150 = vector.shape_cast %149 : vector<1x8x128xf32> to vector<8x128xf32>
    %151 = arith.addf %150, %147 : vector<8x128xf32>
    %152 = arith.index_cast %c7_i32 : i32 to index
    %c0_88 = arith.constant 0 : index
    %c0_89 = arith.constant 0 : index
    %153 = vector.load %arg8[%152, %c0_88, %c0_89] : memref<8x8x128xf32, #tpu.memory_space<vmem>>, vector<1x8x128xf32>
    %154 = vector.shape_cast %153 : vector<1x8x128xf32> to vector<8x128xf32>
    %155 = vector.shape_cast %151 : vector<8x128xf32> to vector<1x8x128xf32>
    tpu.vector_store %arg8[%152, %c0_88, %c0_89], %155 {strides = array<i32>} : memref<8x8x128xf32, #tpu.memory_space<vmem>>, vector<1x8x128xf32>,
    %cst_90 = arith.constant 0.000000e+00 : f32
    %156 = vector.broadcast %cst_90 : f32 to vector<8x128xf32>
    %157 = arith.cmpf oge, %151, %156 : vector<8x128xf32>
    %158 = arith.extui %157 : vector<8x128xi1> to vector<8x128xi32>
    %159 = arith.sitofp %158 : vector<8x128xi32> to vector<8x128xf32>
    %160 = arith.truncf %159 : vector<8x128xf32> to vector<8x128xbf16>
    %161 = arith.index_cast %c7_i32 : i32 to index
    %c0_91 = arith.constant 0 : index
    %c0_92 = arith.constant 0 : index
    %162 = vector.load %arg7[%161, %c0_91, %c0_92] : memref<8x8x128xbf16, #tpu.memory_space<vmem>>, vector<1x8x128xbf16>
    %163 = vector.shape_cast %162 : vector<1x8x128xbf16> to vector<8x128xbf16>
    %164 = vector.shape_cast %160 : vector<8x128xbf16> to vector<1x8x128xbf16>
    tpu.vector_store %arg7[%161, %c0_91, %c0_92], %164 {strides = array<i32>} : memref<8x8x128xbf16, #tpu.memory_space<vmem>>, vector<1x8x128xbf16>,
    %c8_i32 = arith.constant 8 : i32
    %c0_93 = arith.constant 0 : index
    %c0_94 = arith.constant 0 : index
    %165 = vector.load %arg10[%c0_93, %c0_94] : memref<8x128xbf16, #tpu.memory_space<vmem>>, vector<8x128xbf16>
    tpu.vector_store %arg10[%c0_93, %c0_94], %160 {strides = array<i32>} : memref<8x128xbf16, #tpu.memory_space<vmem>>, vector<8x128xbf16>,
    %c0_95 = arith.constant 0 : index
    %c0_96 = arith.constant 0 : index
    %c0_97 = arith.constant 0 : index
    %166 = vector.load %arg8[%c0_95, %c0_96, %c0_97] : memref<8x8x128xf32, #tpu.memory_space<vmem>>, vector<8x8x128xf32>
    %167 = arith.negf %166 : vector<8x8x128xf32>
    %168 = math.exp %167 : vector<8x8x128xf32>
    %cst_98 = arith.constant 1.000000e+00 : f32
    %169 = vector.broadcast %cst_98 : f32 to vector<8x8x128xf32>
    %170 = arith.addf %169, %168 : vector<8x8x128xf32>
    %171 = arith.divf %169, %170 : vector<8x8x128xf32>
    %c0_99 = arith.constant 0 : index
    %c0_100 = arith.constant 0 : index
    %c0_101 = arith.constant 0 : index
    %172 = vector.load %arg9[%c0_99, %c0_100, %c0_101] : memref<8x8x128xf32, #tpu.memory_space<vmem>>, vector<8x8x128xf32>
    tpu.vector_store %arg9[%c0_99, %c0_100, %c0_101], %171 {strides = array<i32>} : memref<8x8x128xf32, #tpu.memory_space<vmem>>, vector<8x8x128xf32>,
    return
  }
  func.func @transform_0(%arg0: i32, %arg1: i32) -> (i32, i32, i32) {
    %c0_i32 = arith.constant 0 : i32
    %c0_i32_0 = arith.constant 0 : i32
    return %arg1, %arg0, %c0_i32 : i32, i32, i32
  }
  func.func @transform_1(%arg0: i32, %arg1: i32) -> (i32, i32) {
    %c0_i32 = arith.constant 0 : i32
    %c0_i32_0 = arith.constant 0 : i32
    %c0_i32_1 = arith.constant 0 : i32
    return %c0_i32, %c0_i32_0 : i32, i32
  }
  func.func @transform_2(%arg0: i32, %arg1: i32) -> (i32, i32) {
    %c0_i32 = arith.constant 0 : i32
    %c0_i32_0 = arith.constant 0 : i32
    %c0_i32_1 = arith.constant 0 : i32
    return %c0_i32, %c0_i32_0 : i32, i32
  }
  func.func @transform_3(%arg0: i32, %arg1: i32) -> (i32, i32) {
    %c0_i32 = arith.constant 0 : i32
    %c0_i32_0 = arith.constant 0 : i32
    %c0_i32_1 = arith.constant 0 : i32
    return %c0_i32, %c0_i32_0 : i32, i32
  }
  func.func @transform_4(%arg0: i32, %arg1: i32) -> (i32, i32) {
    %c0_i32 = arith.constant 0 : i32
    %c0_i32_0 = arith.constant 0 : i32
    return %arg0, %c0_i32 : i32, i32
  }
  func.func @transform_5(%arg0: i32, %arg1: i32) -> (i32, i32, i32) {
    %c0_i32 = arith.constant 0 : i32
    %c0_i32_0 = arith.constant 0 : i32
    return %arg1, %arg0, %c0_i32 : i32, i32, i32
  }
  func.func @transform_6(%arg0: i32, %arg1: i32) -> (i32, i32, i32) {
    %c0_i32 = arith.constant 0 : i32
    %c0_i32_0 = arith.constant 0 : i32
    return %arg1, %arg0, %c0_i32 : i32, i32, i32
  }
  func.func @transform_7(%arg0: i32, %arg1: i32) -> (i32, i32, i32) {
    %c0_i32 = arith.constant 0 : i32
    %c0_i32_0 = arith.constant 0 : i32
    return %arg1, %arg0, %c0_i32 : i32, i32, i32
  }
}

</mosaic_0001>

<bundles_post_ra>
// kernel: tpu_custom_call.1
= control target key start
LH: loop header
LB: loop body
LE: loop exit
PB: predicated region body
PF: predicated region fallthrough
CT: control target
= control target key end

     0   :  { %13 = vsyncpa [#allocation4], 0  ;;  %s2128_s0 = inlined_call_operand.hbm [shape: bf16[8,8,32], index: 0, kind: input, shape index: {}]   ;;  %s2129_s1 = inlined_call_operand.hbm [shape: bf16[32,128], index: 1, kind: input, shape index: {}]   ;;  %s2130_s2 = inlined_call_operand.hbm [shape: bf16[128,128], index: 2, kind: input, shape index: {}]   ;;  %s2131_s3 = inlined_call_operand.vmem [shape: f32[1,128], index: 3, kind: input, shape index: {}]   ;;  %s2132_s4 = inlined_call_operand.vmem [shape: bf16[8,128], index: 4, kind: input, shape index: {}]   ;;  %s2133_s5 = inlined_call_operand.hbm [shape: bf16[8,8,128], index: 5, kind: output, shape index: {0}]   ;;  %s2134_s6 = inlined_call_operand.hbm [shape: f32[8,8,128], index: 6, kind: output, shape index: {1}]   ;;  %s2135_s7 = inlined_call_operand.hbm [shape: f32[8,8,128], index: 7, kind: output, shape index: {2}]  }
   0x1   :  { %14 = vsyncpa [#allocation7], 0 }
   0x2   :  { %15 = vsyncpa [#allocation5], 0 }
   0x3   :  { %16 = vsyncpa [#allocation11], 0  ;;  %s1845_s24 = smov [#allocation6]   ;;  %s1846_s26 = smov [#allocation3]  }
   0x4   :  { %s34_s25 = sshll.u32 %s1845_s24, 4  ;;  %s22_s27 = sshll.u32 %s1846_s26, 4  ;;  %s35_s25 = int_to_ptr.vmem [resolvable:$true] %s34_s25  ;;  %s1898_s27 = int_to_ptr.vmem [resolvable:$true] %s22_s27 }
   0x5   :  { %s1705_s30 = scalar_lea.hbm %s2129_s1, 256 }
   0x6   :  { %p1706_p0 = scmp.ne.s32.totalorder %s2129_s1, %s1705_s30  ;;  %p1709_p1 = scmp.lt.u32.totalorder %s1705_s30, %s2129_s1 }
   0x8   :  { %p1711_p2 = pnand %p1709_p1, %p1706_p0 }
   0xa   :  { %1714 = shalt.err (!%p1711_p2)
}
   0xb   :  { %s1715_s12 = scalar_lea.vmem %s35_s25, 256  ;;  %p1720_p4 = scmp.lt.s32.totalorder %s35_s25, %s35_s25 }
   0xc   :  { %p1716_p3 = scmp.ne.s32.totalorder %s35_s25, %s1715_s12  ;;  %p1721_p5 = scmp.lt.s32.totalorder %s1715_s12, %s1715_s12 }
   0xe   :  { %p1722_p6 = por %p1721_p5, %p1720_p4 }
  0x10   :  { %p1723_p7 = pnand %p1722_p6, %p1716_p3 }
  0x12   :  { %1726 = shalt.err (!%p1723_p7)
}
  0x13   :  { %s1847_s13 = smov 64   ;;  %s1848_s14 = smov 4  }
  0x14   :  { %40 = dma.hbm_to_vmem [thread:$0]  %s2129_s1, 256, %s35_s25, [#allocation7], %s1847_s13, %s1847_s13, %s1848_s14  }
  0x15   :  { %s1727_s19 = scalar_lea.hbm %s2128_s0, 512 }
  0x16   :  { %p1728_p8 = scmp.ne.s32.totalorder %s2128_s0, %s1727_s19  ;;  %p1731_p9 = scmp.lt.u32.totalorder %s1727_s19, %s2128_s0 }
  0x18   :  { %p1733_p10 = pnand %p1731_p9, %p1728_p8 }
  0x1a   :  { %1736 = shalt.err (!%p1733_p10)
}
  0x1b   :  { %s1737_s24 = scalar_lea.vmem %s1898_s27, 512  ;;  %p1742_p12 = scmp.lt.s32.totalorder %s1898_s27, %s1898_s27 }
  0x1c   :  { %p1738_p11 = scmp.ne.s32.totalorder %s1898_s27, %s1737_s24  ;;  %p1743_p13 = scmp.lt.s32.totalorder %s1737_s24, %s1737_s24 }
  0x1e   :  { %p1744_p0 = por %p1743_p13, %p1742_p12 }
  0x20   :  { %p1745_p1 = pnand %p1744_p0, %p1738_p11 }
  0x22   :  { %1748 = shalt.err (!%p1745_p1)
}
  0x23   :  { %28 = dma.hbm_to_vmem [thread:$0]  %s2128_s0, 512, %s1898_s27, [#allocation4], %s1847_s13, %s1847_s13, %s1848_s14  }
  0x24   :  { %s1849_s26 = smov [#allocation8]   ;;  %s1749_s8 = scalar_lea.hbm %s2130_s2, 1024 }
  0x25   :  { %s46_s28 = sshll.u32 %s1849_s26, 4  ;;  %p1750_p2 = scmp.ne.s32.totalorder %s2130_s2, %s1749_s8  ;;  %s47_s28 = int_to_ptr.vmem [resolvable:$true] %s46_s28 }
  0x26   :  { %p1753_p3 = scmp.lt.u32.totalorder %s1749_s8, %s2130_s2 }
  0x28   :  { %p1755_p4 = pnand %p1753_p3, %p1750_p2 }
  0x2a   :  { %1758 = shalt.err (!%p1755_p4)
}
  0x2b   :  { %s1759_s15 = scalar_lea.vmem %s47_s28, 1024  ;;  %p1764_p6 = scmp.lt.s32.totalorder %s47_s28, %s47_s28 }
  0x2c   :  { %p1760_p5 = scmp.ne.s32.totalorder %s47_s28, %s1759_s15  ;;  %p1765_p7 = scmp.lt.s32.totalorder %s1759_s15, %s1759_s15 }
  0x2e   :  { %p1766_p8 = por %p1765_p7, %p1764_p6 }
  0x30   :  { %p1767_p9 = pnand %p1766_p8, %p1760_p5 }
  0x32   :  { %1770 = shalt.err (!%p1767_p9)
}
  0x33   :  { %52 = dma.hbm_to_vmem [thread:$0]  %s2130_s2, 1024, %s47_s28, [#allocation7], %s1847_s13, %s1847_s13, %s1848_s14  }
  0x34   :  { %1837 = dma.done.wait [#allocation4], 512  }
  0x35   :  { %1838 = vsyncadd [#allocation4], 4294966784 }
  0x36   :  { %1839 = dma.done.wait [#allocation7], 1280  }
  0x37   :  { %1840 = vsyncadd [#allocation7], 4294966016  ;;  %v1850_v0 = vmov 0.0   ;;  %vm1851_vm0 = vmmov 0   ;;  %v1603_v1 = vld [vmem:[#allocation8] sm:$0xff]   ;;  %v1604_v2 = vld [vmem:[#allocation8 + $0x8] sm:$0xff]  }
  0x38   :  { %1430 = vmatprep.subr.bf16.mxu1 %v1850_v0  ;;  %1446 = vmatprep.mubr.msk.bf16.mxu1 %vm1851_vm0, %v1850_v0  ;;  %v1606_v3 = vld [vmem:[#allocation6] sm:$0xff]   ;;  %v1608_v5 = vld [vmem:[#allocation6 + $0x8] sm:$0xff]   ;;  %vm124_vm1 = vcmask 261120   ;;  %v71_v9 = vld [vmem:[%s2132_s4] sm:$0xf]  ;;  %s1854_s19 = smov [#allocation9]  }
  0x39   :  { %1431 = vmatpush3.bf16.msra.mxu1 %v1603_v1  ;;  %v1605_v4 = vld [vmem:[#allocation8 + $0x10] sm:$0xff]   ;;  %1418 = vmatprep.subr.bf16.mxu0 %v1606_v3  ;;  %v1611_v7 = vld [vmem:[#allocation3 + $0x8] sm:$0xff]   ;;  %72 = vst [vmem:[#allocation2] sm:$0xf] %v71_v9  ;;  %v1615_v10 = vld [vmem:[#allocation8] sm:$0xff]   ;;  %s1191_s20 = sshll.u32 %s1854_s19, 4  ;;  %s1192_s20 = int_to_ptr.vmem [resolvable:$true] %s1191_s20 }
  0x3a   :  { %1432 = vmatprep.subr.bf16.mxu1 %v1850_v0  ;;  %1419 = vmatpush3.bf16.msra.mxu0 %v1606_v3  ;;  %v1609_v6 = vld [vmem:[#allocation3] sm:$0xff]   ;;  %v1607_v8 = vld [vmem:[#allocation8 + $0x18] sm:$0xff]   ;;  %v1610_v11 = vld [vmem:[#allocation8 + $0x20] sm:$0xff]   ;;  %v1852_v46 = vmov 1.0|1.0  }
  0x3b   :  { %1420 = vmatprep.subr.bf16.mxu0 %v1608_v5  ;;  %1422 = vmatprep.mubr.msk.bf16.mxu0 %vm124_vm1, %v1609_v6  ;;  %v1616_v12 = vld [vmem:[#allocation8 + $0x8] sm:$0xff]   ;;  %v1617_v14 = vld [vmem:[#allocation8 + $0x10] sm:$0xff]   ;;  %v1614_v16 = vld [vmem:[#allocation8 + $0x38] sm:$0xff]  }
  0x3c   :  { %v1612_v13 = vld [vmem:[#allocation8 + $0x28] sm:$0xff]   ;;  %v1613_v15 = vld [vmem:[#allocation8 + $0x30] sm:$0xff]   ;;  %v1618_v18 = vld [vmem:[#allocation8 + $0x18] sm:$0xff]  }
  0x3d   :  { %1433 = vmatpush3.bf16.msra.mxu1 %v1604_v2  ;;  %v1619_v19 = vld [vmem:[#allocation8 + $0x20] sm:$0xff]   ;;  %v1621_v21 = vld [vmem:[#allocation3 + $0x18] sm:$0xff]   ;;  %v1623_v23 = vld [vmem:[#allocation8 + $0x30] sm:$0xff]  }
  0x3e   :  { %1434 = vmatprep.subr.bf16.mxu1 %v1850_v0  ;;  %1421 = vmatpush3.bf16.msra.mxu0 %v1608_v5  ;;  %v1620_v20 = vld [vmem:[#allocation3 + $0x10] sm:$0xff]   ;;  %v1622_v22 = vld [vmem:[#allocation8 + $0x28] sm:$0xff]   ;;  %v1624_v24 = vld [vmem:[#allocation8 + $0x38] sm:$0xff]  }
  0x3f   :  { %1450 = vmatprep.subr.bf16.mxu0 %v1850_v0  ;;  %v1625_v25 = vld [vmem:[#allocation8] sm:$0xff]   ;;  %v1626_v26 = vld [vmem:[#allocation8 + $0x8] sm:$0xff]   ;;  %v1627_v27 = vld [vmem:[#allocation8 + $0x10] sm:$0xff]  }
  0x40   :  { %v210_v17 = vld [vmem:[#allocation2] sm:$0xf]  ;;  %v1628_v28 = vld [vmem:[#allocation8 + $0x18] sm:$0xff]   ;;  %v1629_v29 = vld [vmem:[#allocation8 + $0x20] sm:$0xff]  }
  0x41   :  { %1435 = vmatpush3.bf16.msra.mxu1 %v1605_v4  ;;  %1423 = vmatmul.mubr.msk.bf16.vlgmr.msra.gmra.mrb[0].mxu0 %vm124_vm1, %v1611_v7  ;;  %v1630_v30 = vld [vmem:[#allocation8 + $0x28] sm:$0xff]   ;;  %v1631_v31 = vld [vmem:[#allocation8 + $0x30] sm:$0xff]   ;;  %v1632_v54 = vld [vmem:[#allocation8 + $0x38] sm:$0xff]  }
  0x42   :  { %1436 = vmatprep.subr.bf16.mxu1 %v1850_v0  ;;  %1451 = vmatpush3.bf16.msra.mxu0 %v1615_v10  ;;  %v1995_v36 = vld [vmem:[%s2131_s3] ss:$0 sm:$0xff]  ;;  %v1633_v55 = vld [vmem:[#allocation8] sm:$0xff]   ;;  %v1635_v57 = vld [vmem:[#allocation8 + $0x10] sm:$0xff]   ;;  %s1853_s3 = smov [#allocation10]  }
  0x43   :  { %1452 = vmatprep.subr.bf16.mxu0 %v1850_v0  ;;  %1426 = vmatprep.mubr.msk.bf16.mxu0 %vm124_vm1, %v1620_v20  ;;  %v1634_v56 = vld [vmem:[#allocation8 + $0x8] sm:$0xff]   ;;  %v1636_v58 = vld [vmem:[#allocation8 + $0x18] sm:$0xff]   ;;  %v1637_v59 = vld [vmem:[#allocation8 + $0x20] sm:$0xff]   ;;  %s1203_s18 = sshll.u32 %s1853_s3, 4  ;;  %s1204_s18 = int_to_ptr.vmem [resolvable:$true] %s1203_s18 }
  0x44   :  { %v1638_v60 = vld [vmem:[#allocation8 + $0x28] sm:$0xff]   ;;  %v1639_v61 = vld [vmem:[#allocation8 + $0x30] sm:$0xff]   ;;  %s1771_s21 = scalar_lea.vmem %s1204_s18, 1024  ;;  %p1776_p11 = scmp.lt.s32.totalorder %s1204_s18, %s1204_s18 }
  0x45   :  { %1437 = vmatpush3.bf16.msra.mxu1 %v1607_v8  ;;  %p1772_p10 = scmp.ne.s32.totalorder %s1204_s18, %s1771_s21  ;;  %p1777_p12 = scmp.lt.s32.totalorder %s1771_s21, %s1771_s21 }
  0x46   :  { %1438 = vmatprep.subr.bf16.mxu1 %v1850_v0  ;;  %1453 = vmatpush3.bf16.msra.mxu0 %v1616_v12  ;;  %v1641_v12 = vld [vmem:[#allocation8] sm:$0xff]  }
  0x47   :  { %1454 = vmatprep.subr.bf16.mxu0 %v1850_v0  ;;  %p1778_p13 = por %p1777_p12, %p1776_p11 }
  0x49   :  { %1439 = vmatpush3.bf16.msra.mxu1 %v1610_v11  ;;  %1427 = vmatmul.mubr.msk.bf16.gmra.mrb[4].mxu0 %vm124_vm1, %v1621_v21  ;;  %v1640_v11 = vld [vmem:[#allocation8 + $0x38] sm:$0xff]   ;;  %p1779_p0 = pnand %p1778_p13, %p1772_p10 }
  0x4a   :  { %1440 = vmatprep.subr.bf16.mxu1 %v1850_v0  ;;  %1455 = vmatpush3.bf16.msra.mxu0 %v1617_v14  ;;  %v1643_v14 = vld [vmem:[#allocation8 + $0x10] sm:$0xff]  }
  0x4b   :  { %1456 = vmatprep.subr.bf16.mxu0 %v1850_v0  ;;  %1466 = vmatprep.mubr.msk.bf16.mxu0 %vm1851_vm0, %v1850_v0 }
  0x4d   :  { %1441 = vmatpush3.bf16.msra.mxu1 %v1612_v13  ;;  %v1642_v13 = vld [vmem:[#allocation8 + $0x8] sm:$0xff]  }
  0x4e   :  { %1442 = vmatprep.subr.bf16.mxu1 %v1850_v0  ;;  %1457 = vmatpush3.bf16.msra.mxu0 %v1618_v18  ;;  %v1647_v18 = vld [vmem:[#allocation8 + $0x30] sm:$0xff]  }
  0x4f   :  { %1458 = vmatprep.subr.bf16.mxu0 %v1850_v0 }
  0x51   :  { %1443 = vmatpush3.bf16.msra.mxu1 %v1613_v15  ;;  %v1644_v15 = vld [vmem:[#allocation8 + $0x18] sm:$0xff]  }
  0x52   :  { %1444 = vmatprep.subr.bf16.mxu1 %v1850_v0  ;;  %1459 = vmatpush3.bf16.msra.mxu0 %v1619_v19 }
  0x53   :  { %1460 = vmatprep.subr.bf16.mxu0 %v1850_v0 }
  0x55   :  { %1445 = vmatpush3.bf16.msra.mxu1 %v1614_v16  ;;  %v1645_v16 = vld [vmem:[#allocation8 + $0x20] sm:$0xff]  }
  0x56   :  { %1470 = vmatprep.subr.bf16.mxu1 %v1850_v0  ;;  %1461 = vmatpush3.bf16.msra.mxu0 %v1622_v22 }
  0x57   :  { %1462 = vmatprep.subr.bf16.mxu0 %v1850_v0 }
  0x58   :  { %1447 = vmatmul.mubr.bf16.vlgmr.msra.gmra.mrb[0].mxu1 %v210_v17  ;;  %v1646_v17 = vld [vmem:[#allocation8 + $0x28] sm:$0xff]  }
  0x59   :  { %1486 = vmatprep.mubr.msk.bf16.mxu1 %vm1851_vm0, %v1850_v0  ;;  %1471 = vmatpush3.bf16.msra.mxu1 %v1625_v25 }
  0x5a   :  { %1463 = vmatpush3.bf16.msra.mxu0 %v1623_v23  ;;  %1472 = vmatprep.subr.bf16.mxu1 %v1850_v0 }
  0x5b   :  { %1464 = vmatprep.subr.bf16.mxu0 %v1850_v0 }
  0x5d   :  { %1473 = vmatpush3.bf16.msra.mxu1 %v1626_v26 }
  0x5e   :  { %1465 = vmatpush3.bf16.msra.mxu0 %v1624_v24  ;;  %1474 = vmatprep.subr.bf16.mxu1 %v1850_v0 }
  0x5f   :  { %1490 = vmatprep.subr.bf16.mxu0 %v1850_v0 }
  0x61   :  { %1475 = vmatpush3.bf16.msra.mxu1 %v1627_v27 }
  0x62   :  { %1476 = vmatprep.subr.bf16.mxu1 %v1850_v0 }
  0x65   :  { %1477 = vmatpush3.bf16.msra.mxu1 %v1628_v28 }
  0x66   :  { %1478 = vmatprep.subr.bf16.mxu1 %v1850_v0 }
  0x69   :  { %1479 = vmatpush3.bf16.msra.mxu1 %v1629_v29 }
  0x6a   :  { %1480 = vmatprep.subr.bf16.mxu1 %v1850_v0 }
  0x6d   :  { %1481 = vmatpush3.bf16.msra.mxu1 %v1630_v30 }
  0x6e   :  { %1482 = vmatprep.subr.bf16.mxu1 %v1850_v0 }
  0x71   :  { %1483 = vmatpush3.bf16.msra.mxu1 %v1631_v31  ;;  %v1648_v31 = vld [vmem:[#allocation8 + $0x38] sm:$0xff]  }
  0x72   :  { %1484 = vmatprep.subr.bf16.mxu1 %v1850_v0 }
  0x75   :  { %1485 = vmatpush3.bf16.msra.mxu1 %v1632_v54 }
  0x76   :  { %1510 = vmatprep.subr.bf16.mxu1 %v1850_v0 }
 0x114   :  { %v1988_v32 = vpop.f32.mrb[0].mxu0 }
 0x115   :  { %v171_v33 = vpop.f32.mrb[1].mxu0  ;;  %v180_v19 = vadd.f32 %v1988_v32, %v1995_v36  ;;  %v1649_v32 = vld [vmem:[#allocation8] sm:$0xff]  }
 0x116   :  { %v1990_v34 = vpop.f32.mrb[2].mxu0  ;;  %v172_v37 = vadd.f32 %v1995_v36, %v171_v33  ;;  %v1650_v33 = vld [vmem:[#allocation8 + $0x8] sm:$0xff]  }
 0x117   :  { %v174_v35 = vpop.f32.mrb[3].mxu0 }
 0x118   :  { %v175_v62 = vadd.f32 %v1995_v36, %v174_v35  ;;  %v1651_v35 = vld [vmem:[#allocation8 + $0x10] sm:$0xff]  }
 0x11c   :  { %v2002_v50 = vpop.f32.mrb[4].mxu0 }
 0x11d   :  { %v2004_v51 = vpop.f32.mrb[5].mxu0 }
 0x11e   :  { %v2006_v52 = vpop.f32.mrb[6].mxu0 }
 0x11f   :  { %v2008_v53 = vpop.f32.mrb[7].mxu0 }
 0x12b   :  { %v309_v38 = vpop.f32.mrb[0].mxu1 }
 0x12c   :  { %v316_v39 = vadd.f32 %v309_v38, %v172_v37  ;;  %v1448_v40 = vpop.f32.mrb[1].mxu1  ;;  %v1652_v37 = vld [vmem:[#allocation8 + $0x18] sm:$0xff]   ;;  %v1653_v38 = vld [vmem:[#allocation8 + $0x20] sm:$0xff]  }
 0x12d   :  { %v312_v41 = vpop.f32.mrb[2].mxu1  ;;  %v1655_v40 = vld [vmem:[#allocation8 + $0x30] sm:$0xff]  }
 0x12e   :  { %317 = vst [vmem:[#allocation10] sm:$0xff] %v316_v39  ;;  %vm318_vm2 = vcmp.ge.f32.partialorder %v316_v39, 0.0  ;;  %v1332_v42 = vmul.f32 -1.442695, %v316_v39  ;;  %v1449_v43 = vpop.f32.mrb[3].mxu1  ;;  %v1654_v39 = vld [vmem:[#allocation8 + $0x28] sm:$0xff]   ;;  %v183_v41 = vadd.f32 %v1990_v34, %v1995_v36 }
 0x12f   :  { %v1254_v44 = vsel %vm318_vm2, 1.0, %v1850_v0  ;;  %vm1263_vm3 = vmpackc.low %vm318_vm2, %vm318_vm2 }
 0x130   :  { %v321_v45 = vpack.c.bf16 %v1254_v44, %v1254_v44  ;;  %1673 = vpow2.f32 %v1332_v42  ;;  %1467 = vmatmul.mubr.msk.bf16.vlgmr.msra.gmra.mrb[8].mxu0 %vm1263_vm3, %v1852_v46 }
 0x131   :  { %1506 = vmatprep.mubr.msk.bf16.mxu0 %vm1851_vm0, %v1850_v0  ;;  %1491 = vmatpush3.bf16.msra.mxu0 %v1633_v55 }
 0x132   :  { %322 = vst [vmem:[#allocation9] sm:$0xf] %v321_v45  ;;  %1492 = vmatprep.subr.bf16.mxu0 %v1850_v0 }
 0x135   :  { %1493 = vmatpush3.bf16.msra.mxu0 %v1634_v56 }
 0x136   :  { %1494 = vmatprep.subr.bf16.mxu0 %v1850_v0 }
 0x139   :  { %1495 = vmatpush3.bf16.msra.mxu0 %v1635_v57  ;;  %v1656_v57 = vld [vmem:[#allocation8 + $0x38] sm:$0xff]  }
 0x13a   :  { %v1674_v47 = vpop.eup %1673  ;;  %1496 = vmatprep.subr.bf16.mxu0 %v1850_v0 }
 0x13b   :  { %v1154_v48 = vadd.f32 1.0, %v1674_v47 }
 0x13d   :  { %1675 = vrcp.f32 %v1154_v48  ;;  %1497 = vmatpush3.bf16.msra.mxu0 %v1636_v58  ;;  %v1657_v58 = vld [vmem:[#allocation8] sm:$0xff]  }
 0x13e   :  { %1498 = vmatprep.subr.bf16.mxu0 %v1850_v0 }
 0x141   :  { %1499 = vmatpush3.bf16.msra.mxu0 %v1637_v59  ;;  %v1658_v59 = vld [vmem:[#allocation8 + $0x8] sm:$0xff]  }
 0x142   :  { %1500 = vmatprep.subr.bf16.mxu0 %v1850_v0 }
 0x145   :  { %1501 = vmatpush3.bf16.msra.mxu0 %v1638_v60  ;;  %v1659_v60 = vld [vmem:[#allocation8 + $0x10] sm:$0xff]  }
 0x146   :  { %1502 = vmatprep.subr.bf16.mxu0 %v1850_v0 }
 0x147   :  { %v1676_v49 = vpop.eup %1675 }
 0x148   :  { %1178 = vst [vmem:[#allocation12] sm:$0xff] %v1676_v49 }
 0x149   :  { %1503 = vmatpush3.bf16.msra.mxu0 %v1639_v61  ;;  %v1660_v61 = vld [vmem:[#allocation8 + $0x18] sm:$0xff]  }
 0x14a   :  { %1504 = vmatprep.subr.bf16.mxu0 %v1850_v0 }
 0x14d   :  { %1505 = vmatpush3.bf16.msra.mxu0 %v1640_v11 }
 0x14e   :  { %1530 = vmatprep.subr.bf16.mxu0 %v1850_v0 }
 0x203   :  { %v421_v63 = vpop.f32.mrb[8].mxu0 }
 0x204   :  { %v429_v1 = vadd.f32 %v421_v63, %v175_v62  ;;  %v1468_v2 = vpop.f32.mrb[9].mxu0  ;;  %v1661_v62 = vld [vmem:[#allocation8 + $0x20] sm:$0xff]   ;;  %v1662_v63 = vld [vmem:[#allocation8 + $0x28] sm:$0xff]  }
 0x205   :  { %v424_v3 = vpop.f32.mrb[10].mxu0  ;;  %v188_v2 = vadd.f32 %v1995_v36, %v2004_v51 }
 0x206   :  { %430 = vst [vmem:[#allocation10 + $0x8] sm:$0xff] %v429_v1  ;;  %vm431_vm4 = vcmp.ge.f32.partialorder %v429_v1, 0.0  ;;  %v1333_v4 = vmul.f32 -1.442695, %v429_v1  ;;  %v1469_v5 = vpop.f32.mrb[11].mxu0  ;;  %v1663_v1 = vld [vmem:[#allocation8 + $0x30] sm:$0xff]  }
 0x207   :  { %v1265_v6 = vsel %vm431_vm4, 1.0, %v1850_v0  ;;  %vm1274_vm5 = vmpackc.low %vm431_vm4, %vm431_vm4 }
 0x208   :  { %v434_v7 = vpack.c.bf16 %v1265_v6, %v1265_v6  ;;  %1677 = vpow2.f32 %v1333_v4  ;;  %1487 = vmatmul.mubr.msk.bf16.vlgmr.msra.gmra.mrb[4].mxu1 %vm1274_vm5, %v1852_v46 }
 0x209   :  { %1526 = vmatprep.mubr.msk.bf16.mxu1 %vm1851_vm0, %v1850_v0  ;;  %1511 = vmatpush3.bf16.msra.mxu1 %v1641_v12 }
 0x20a   :  { %436 = vst [vmem:[#allocation9 + $0x4] sm:$0xf] %v434_v7  ;;  %1512 = vmatprep.subr.bf16.mxu1 %v1850_v0 }
 0x20d   :  { %1513 = vmatpush3.bf16.msra.mxu1 %v1642_v13  ;;  %v1664_v13 = vld [vmem:[#allocation8 + $0x38] sm:$0xff]  }
 0x20e   :  { %1514 = vmatprep.subr.bf16.mxu1 %v1850_v0 }
 0x211   :  { %1515 = vmatpush3.bf16.msra.mxu1 %v1643_v14  ;;  %v1665_v14 = vld [vmem:[#allocation8] sm:$0xff]  }
 0x212   :  { %v1678_v8 = vpop.eup %1677  ;;  %1516 = vmatprep.subr.bf16.mxu1 %v1850_v0 }
 0x213   :  { %v1155_v9 = vadd.f32 1.0, %v1678_v8 }
 0x215   :  { %1679 = vrcp.f32 %v1155_v9  ;;  %1517 = vmatpush3.bf16.msra.mxu1 %v1644_v15  ;;  %v1666_v15 = vld [vmem:[#allocation8 + $0x8] sm:$0xff]  }
 0x216   :  { %1518 = vmatprep.subr.bf16.mxu1 %v1850_v0 }
 0x219   :  { %1519 = vmatpush3.bf16.msra.mxu1 %v1645_v16  ;;  %v1667_v16 = vld [vmem:[#allocation8 + $0x10] sm:$0xff]  }
 0x21a   :  { %1520 = vmatprep.subr.bf16.mxu1 %v1850_v0 }
 0x21d   :  { %1521 = vmatpush3.bf16.msra.mxu1 %v1646_v17  ;;  %v1668_v17 = vld [vmem:[#allocation8 + $0x18] sm:$0xff]  }
 0x21e   :  { %1522 = vmatprep.subr.bf16.mxu1 %v1850_v0 }
 0x21f   :  { %v1680_v10 = vpop.eup %1679 }
 0x220   :  { %1179 = vst [vmem:[#allocation12 + $0x8] sm:$0xff] %v1680_v10 }
 0x221   :  { %1523 = vmatpush3.bf16.msra.mxu1 %v1647_v18  ;;  %v1669_v18 = vld [vmem:[#allocation8 + $0x20] sm:$0xff]  }
 0x222   :  { %1524 = vmatprep.subr.bf16.mxu1 %v1850_v0 }
 0x225   :  { %1525 = vmatpush3.bf16.msra.mxu1 %v1648_v31 }
 0x226   :  { %1550 = vmatprep.subr.bf16.mxu1 %v1850_v0 }
 0x2db   :  { %v535_v20 = vpop.f32.mrb[4].mxu1 }
 0x2dc   :  { %v543_v21 = vadd.f32 %v535_v20, %v180_v19  ;;  %v1488_v22 = vpop.f32.mrb[5].mxu1  ;;  %v1670_v19 = vld [vmem:[#allocation8 + $0x28] sm:$0xff]   ;;  %v1671_v20 = vld [vmem:[#allocation8 + $0x30] sm:$0xff]  }
 0x2dd   :  { %v538_v23 = vpop.f32.mrb[6].mxu1 }
 0x2de   :  { %544 = vst [vmem:[#allocation10 + $0x10] sm:$0xff] %v543_v21  ;;  %vm545_vm6 = vcmp.ge.f32.partialorder %v543_v21, 0.0  ;;  %v1334_v24 = vmul.f32 -1.442695, %v543_v21  ;;  %v1489_v25 = vpop.f32.mrb[7].mxu1  ;;  %v191_v21 = vadd.f32 %v1995_v36, %v2008_v53 }
 0x2df   :  { %v1276_v26 = vsel %vm545_vm6, 1.0, %v1850_v0  ;;  %vm1285_vm7 = vmpackc.low %vm545_vm6, %vm545_vm6 }
 0x2e0   :  { %v548_v27 = vpack.c.bf16 %v1276_v26, %v1276_v26  ;;  %1681 = vpow2.f32 %v1334_v24  ;;  %1507 = vmatmul.mubr.msk.bf16.vlgmr.msra.gmra.mrb[12].mxu0 %vm1285_vm7, %v1852_v46 }
 0x2e1   :  { %1546 = vmatprep.mubr.msk.bf16.mxu0 %vm1851_vm0, %v1850_v0  ;;  %1531 = vmatpush3.bf16.msra.mxu0 %v1649_v32  ;;  %v1672_v32 = vld [vmem:[#allocation8 + $0x38] sm:$0xff]  }
 0x2e2   :  { %550 = vst [vmem:[#allocation9 + $0x8] sm:$0xf] %v548_v27  ;;  %1532 = vmatprep.subr.bf16.mxu0 %v1850_v0 }
 0x2e5   :  { %1533 = vmatpush3.bf16.msra.mxu0 %v1650_v33  ;;  %v196_v33 = vadd.f32 %v2002_v50, %v1995_v36 }
 0x2e6   :  { %1534 = vmatprep.subr.bf16.mxu0 %v1850_v0 }
 0x2e9   :  { %1535 = vmatpush3.bf16.msra.mxu0 %v1651_v35 }
 0x2ea   :  { %v1682_v28 = vpop.eup %1681  ;;  %1536 = vmatprep.subr.bf16.mxu0 %v1850_v0 }
 0x2eb   :  { %v1156_v29 = vadd.f32 1.0, %v1682_v28 }
 0x2ed   :  { %1683 = vrcp.f32 %v1156_v29  ;;  %1537 = vmatpush3.bf16.msra.mxu0 %v1652_v37 }
 0x2ee   :  { %1538 = vmatprep.subr.bf16.mxu0 %v1850_v0 }
 0x2f1   :  { %1539 = vmatpush3.bf16.msra.mxu0 %v1653_v38 }
 0x2f2   :  { %1540 = vmatprep.subr.bf16.mxu0 %v1850_v0 }
 0x2f5   :  { %1541 = vmatpush3.bf16.msra.mxu0 %v1654_v39 }
 0x2f6   :  { %1542 = vmatprep.subr.bf16.mxu0 %v1850_v0 }
 0x2f7   :  { %v1684_v30 = vpop.eup %1683 }
 0x2f8   :  { %1180 = vst [vmem:[#allocation12 + $0x10] sm:$0xff] %v1684_v30 }
 0x2f9   :  { %1543 = vmatpush3.bf16.msra.mxu0 %v1655_v40 }
 0x2fa   :  { %1544 = vmatprep.subr.bf16.mxu0 %v1850_v0 }
 0x2fd   :  { %1545 = vmatpush3.bf16.msra.mxu0 %v1656_v57 }
 0x2fe   :  { %1570 = vmatprep.subr.bf16.mxu0 %v1850_v0 }
 0x3b3   :  { %v649_v42 = vpop.f32.mrb[12].mxu0 }
 0x3b4   :  { %v657_v43 = vadd.f32 %v649_v42, %v183_v41  ;;  %v1508_v44 = vpop.f32.mrb[13].mxu0 }
 0x3b5   :  { %v652_v45 = vpop.f32.mrb[14].mxu0 }
 0x3b6   :  { %658 = vst [vmem:[#allocation10 + $0x18] sm:$0xff] %v657_v43  ;;  %vm659_vm8 = vcmp.ge.f32.partialorder %v657_v43, 0.0  ;;  %v1335_v47 = vmul.f32 -1.442695, %v657_v43  ;;  %v1509_v48 = vpop.f32.mrb[15].mxu0 }
 0x3b7   :  { %v1287_v49 = vsel %vm659_vm8, 1.0, %v1850_v0  ;;  %vm1296_vm9 = vmpackc.low %vm659_vm8, %vm659_vm8 }
 0x3b8   :  { %v662_v54 = vpack.c.bf16 %v1287_v49, %v1287_v49  ;;  %1685 = vpow2.f32 %v1335_v47  ;;  %1527 = vmatmul.mubr.msk.bf16.vlgmr.msra.gmra.mrb[8].mxu1 %vm1296_vm9, %v1852_v46  ;;  %v199_v47 = vadd.f32 %v2006_v52, %v1995_v36 }
 0x3b9   :  { %1566 = vmatprep.mubr.msk.bf16.mxu1 %vm1851_vm0, %v1850_v0  ;;  %1551 = vmatpush3.bf16.msra.mxu1 %v1657_v58 }
 0x3ba   :  { %664 = vst [vmem:[#allocation9 + $0xc] sm:$0xf] %v662_v54  ;;  %1552 = vmatprep.subr.bf16.mxu1 %v1850_v0 }
 0x3bd   :  { %1553 = vmatpush3.bf16.msra.mxu1 %v1658_v59 }
 0x3be   :  { %1554 = vmatprep.subr.bf16.mxu1 %v1850_v0 }
 0x3c1   :  { %1555 = vmatpush3.bf16.msra.mxu1 %v1659_v60 }
 0x3c2   :  { %v1686_v34 = vpop.eup %1685  ;;  %1556 = vmatprep.subr.bf16.mxu1 %v1850_v0 }
 0x3c3   :  { %v1157_v55 = vadd.f32 1.0, %v1686_v34 }
 0x3c5   :  { %1687 = vrcp.f32 %v1157_v55  ;;  %1557 = vmatpush3.bf16.msra.mxu1 %v1660_v61 }
 0x3c6   :  { %1558 = vmatprep.subr.bf16.mxu1 %v1850_v0 }
 0x3c9   :  { %1559 = vmatpush3.bf16.msra.mxu1 %v1661_v62 }
 0x3ca   :  { %1560 = vmatprep.subr.bf16.mxu1 %v1850_v0 }
 0x3cd   :  { %1561 = vmatpush3.bf16.msra.mxu1 %v1662_v63 }
 0x3ce   :  { %1562 = vmatprep.subr.bf16.mxu1 %v1850_v0 }
 0x3cf   :  { %v1688_v56 = vpop.eup %1687 }
 0x3d0   :  { %1181 = vst [vmem:[#allocation12 + $0x18] sm:$0xff] %v1688_v56 }
 0x3d1   :  { %1563 = vmatpush3.bf16.msra.mxu1 %v1663_v1 }
 0x3d2   :  { %1564 = vmatprep.subr.bf16.mxu1 %v1850_v0 }
 0x3d5   :  { %1565 = vmatpush3.bf16.msra.mxu1 %v1664_v13 }
 0x48b   :  { %v763_v3 = vpop.f32.mrb[8].mxu1 }
 0x48c   :  { %v771_v4 = vadd.f32 %v763_v3, %v188_v2  ;;  %v1528_v5 = vpop.f32.mrb[9].mxu1 }
 0x48d   :  { %v766_v6 = vpop.f32.mrb[10].mxu1 }
 0x48e   :  { %772 = vst [vmem:[#allocation10 + $0x20] sm:$0xff] %v771_v4  ;;  %vm773_vm10 = vcmp.ge.f32.partialorder %v771_v4, 0.0  ;;  %v1336_v7 = vmul.f32 -1.442695, %v771_v4  ;;  %v1529_v8 = vpop.f32.mrb[11].mxu1 }
 0x48f   :  { %v1298_v9 = vsel %vm773_vm10, 1.0, %v1850_v0  ;;  %vm1307_vm11 = vmpackc.low %vm773_vm10, %vm773_vm10 }
 0x490   :  { %v776_v10 = vpack.c.bf16 %v1298_v9, %v1298_v9  ;;  %1689 = vpow2.f32 %v1336_v7  ;;  %1547 = vmatmul.mubr.msk.bf16.vlgmr.msra.gmra.mrb[16].mxu0 %vm1307_vm11, %v1852_v46 }
 0x491   :  { %1586 = vmatprep.mubr.msk.bf16.mxu0 %vm1851_vm0, %v1850_v0  ;;  %1571 = vmatpush3.bf16.msra.mxu0 %v1665_v14 }
 0x492   :  { %778 = vst [vmem:[#allocation9 + $0x10] sm:$0xf] %v776_v10  ;;  %1572 = vmatprep.subr.bf16.mxu0 %v1850_v0 }
 0x495   :  { %1573 = vmatpush3.bf16.msra.mxu0 %v1666_v15 }
 0x496   :  { %1574 = vmatprep.subr.bf16.mxu0 %v1850_v0 }
 0x499   :  { %1575 = vmatpush3.bf16.msra.mxu0 %v1667_v16 }
 0x49a   :  { %v1690_v51 = vpop.eup %1689  ;;  %1576 = vmatprep.subr.bf16.mxu0 %v1850_v0 }
 0x49b   :  { %v1158_v11 = vadd.f32 1.0, %v1690_v51 }
 0x49d   :  { %1691 = vrcp.f32 %v1158_v11  ;;  %1577 = vmatpush3.bf16.msra.mxu0 %v1668_v17 }
 0x49e   :  { %1578 = vmatprep.subr.bf16.mxu0 %v1850_v0 }
 0x4a1   :  { %1579 = vmatpush3.bf16.msra.mxu0 %v1669_v18 }
 0x4a2   :  { %1580 = vmatprep.subr.bf16.mxu0 %v1850_v0 }
 0x4a5   :  { %1581 = vmatpush3.bf16.msra.mxu0 %v1670_v19 }
 0x4a6   :  { %1582 = vmatprep.subr.bf16.mxu0 %v1850_v0 }
 0x4a7   :  { %v1692_v12 = vpop.eup %1691 }
 0x4a8   :  { %1182 = vst [vmem:[#allocation12 + $0x20] sm:$0xff] %v1692_v12 }
 0x4a9   :  { %1583 = vmatpush3.bf16.msra.mxu0 %v1671_v20 }
 0x4aa   :  { %1584 = vmatprep.subr.bf16.mxu0 %v1850_v0 }
 0x4ad   :  { %1585 = vmatpush3.bf16.msra.mxu0 %v1672_v32 }
 0x563   :  { %v877_v22 = vpop.f32.mrb[16].mxu0 }
 0x564   :  { %v885_v23 = vadd.f32 %v877_v22, %v191_v21  ;;  %v1548_v24 = vpop.f32.mrb[17].mxu0 }
 0x565   :  { %v880_v25 = vpop.f32.mrb[18].mxu0 }
 0x566   :  { %886 = vst [vmem:[#allocation10 + $0x28] sm:$0xff] %v885_v23  ;;  %vm887_vm12 = vcmp.ge.f32.partialorder %v885_v23, 0.0  ;;  %v1337_v26 = vmul.f32 -1.442695, %v885_v23  ;;  %v1549_v27 = vpop.f32.mrb[19].mxu0 }
 0x567   :  { %v1309_v28 = vsel %vm887_vm12, 1.0, %v1850_v0  ;;  %vm1318_vm13 = vmpackc.low %vm887_vm12, %vm887_vm12 }
 0x568   :  { %v890_v29 = vpack.c.bf16 %v1309_v28, %v1309_v28  ;;  %1693 = vpow2.f32 %v1337_v26  ;;  %1567 = vmatmul.mubr.msk.bf16.vlgmr.msra.gmra.mrb[12].mxu1 %vm1318_vm13, %v1852_v46 }
 0x56a   :  { %892 = vst [vmem:[#allocation9 + $0x14] sm:$0xf] %v890_v29 }
 0x572   :  { %v1694_v30 = vpop.eup %1693 }
 0x573   :  { %v1159_v31 = vadd.f32 1.0, %v1694_v30 }
 0x575   :  { %1695 = vrcp.f32 %v1159_v31 }
 0x57f   :  { %v1696_v53 = vpop.eup %1695 }
 0x580   :  { %1183 = vst [vmem:[#allocation12 + $0x28] sm:$0xff] %v1696_v53 }
 0x63b   :  { %v991_v35 = vpop.f32.mrb[12].mxu1 }
 0x63c   :  { %v999_v37 = vadd.f32 %v991_v35, %v196_v33  ;;  %v1568_v38 = vpop.f32.mrb[13].mxu1 }
 0x63d   :  { %v994_v39 = vpop.f32.mrb[14].mxu1 }
 0x63e   :  { %1000 = vst [vmem:[#allocation10 + $0x30] sm:$0xff] %v999_v37  ;;  %vm1001_vm14 = vcmp.ge.f32.partialorder %v999_v37, 0.0  ;;  %v1338_v40 = vmul.f32 -1.442695, %v999_v37  ;;  %v1569_v41 = vpop.f32.mrb[15].mxu1 }
 0x63f   :  { %v1320_v42 = vsel %vm1001_vm14, 1.0, %v1850_v0  ;;  %vm1329_vm15 = vmpackc.low %vm1001_vm14, %vm1001_vm14 }
 0x640   :  { %v1004_v43 = vpack.c.bf16 %v1320_v42, %v1320_v42  ;;  %1697 = vpow2.f32 %v1338_v40  ;;  %1587 = vmatmul.mubr.msk.bf16.vlgmr.msra.gmra.mrb[20].mxu0 %vm1329_vm15, %v1852_v46 }
 0x642   :  { %1006 = vst [vmem:[#allocation9 + $0x18] sm:$0xf] %v1004_v43 }
 0x64a   :  { %v1698_v44 = vpop.eup %1697 }
 0x64b   :  { %v1160_v45 = vadd.f32 1.0, %v1698_v44 }
 0x64d   :  { %1699 = vrcp.f32 %v1160_v45 }
 0x657   :  { %v1700_v50 = vpop.eup %1699 }
 0x658   :  { %1184 = vst [vmem:[#allocation12 + $0x30] sm:$0xff] %v1700_v50 }
 0x713   :  { %v1105_v48 = vpop.f32.mrb[20].mxu0 }
 0x714   :  { %v1113_v49 = vadd.f32 %v1105_v48, %v199_v47  ;;  %v1588_v54 = vpop.f32.mrb[21].mxu0 }
 0x715   :  { %v1108_v34 = vpop.f32.mrb[22].mxu0 }
 0x716   :  { %1114 = vst [vmem:[#allocation10 + $0x38] sm:$0xff] %v1113_v49  ;;  %vm1115_vm0 = vcmp.ge.f32.partialorder %v1113_v49, 0.0  ;;  %v1339_v46 = vmul.f32 -1.442695, %v1113_v49  ;;  %v1589_v55 = vpop.f32.mrb[23].mxu0 }
 0x717   :  { %v1331_v56 = vsel %vm1115_vm0, 1.0, %v1850_v0 }
 0x718   :  { %1782 = shalt.err (!%p1779_p0)
}
 0x719   :  { %s1783_s24 = scalar_lea.hbm %s2134_s6, 1024 }
 0x71a   :  { %p1784_p1 = scmp.ne.s32.totalorder %s2134_s6, %s1783_s24  ;;  %p1787_p2 = scmp.lt.u32.totalorder %s1783_s24, %s2134_s6 }
 0x71c   :  { %p1789_p3 = pnand %p1787_p2, %p1784_p1 }
 0x71e   :  { %1792 = shalt.err (!%p1789_p3)
}
 0x71f   :  { %s1855_s29 = smov 128   ;;  %s1856_s30 = smov 8   ;;  %v1118_v0 = vpack.c.bf16 %v1331_v56, %v1331_v56  ;;  %1701 = vpow2.f32 %v1339_v46 }
 0x720   :  { %1209 = dma.vmem_to_hbm [thread:$0]  %s1204_s18, 1024, %s2134_s6, [#allocation11], %s1855_s29, %s1855_s29, %s1856_s30  }
 0x721   :  { %1120 = vst [vmem:[#allocation9 + $0x1c] sm:$0xf] %v1118_v0  ;;  %1121 = vst [vmem:[#allocation2] sm:$0xf] %v1118_v0  ;;  %s1793_s10 = scalar_lea.vmem %s1192_s20, 512  ;;  %p1798_p5 = scmp.lt.s32.totalorder %s1192_s20, %s1192_s20 }
 0x722   :  { %p1794_p4 = scmp.ne.s32.totalorder %s1192_s20, %s1793_s10  ;;  %p1799_p6 = scmp.lt.s32.totalorder %s1793_s10, %s1793_s10 }
 0x724   :  { %p1800_p7 = por %p1799_p6, %p1798_p5 }
 0x726   :  { %p1801_p8 = pnand %p1800_p7, %p1794_p4 }
 0x728   :  { %1804 = shalt.err (!%p1801_p8)
}
 0x729   :  { %s1805_s15 = scalar_lea.hbm %s2133_s5, 512 }
 0x72a   :  { %p1806_p9 = scmp.ne.s32.totalorder %s2133_s5, %s1805_s15  ;;  %p1809_p10 = scmp.lt.u32.totalorder %s1805_s15, %s2133_s5 }
 0x72c   :  { %p1811_p11 = pnand %p1809_p10, %p1806_p9 }
 0x72e   :  { %1814 = shalt.err (!%p1811_p11)
}
 0x72f   :  { %1197 = dma.vmem_to_hbm [thread:$0]  %s1192_s20, 512, %s2133_s5, [#allocation5], %s1847_s13, %s1847_s13, %s1848_s14   ;;  %v1702_v36 = vpop.eup %1701 }
 0x730   :  { %v1161_v52 = vadd.f32 1.0, %v1702_v36  ;;  %s1857_s17 = smov [#allocation12]  }
 0x731   :  { %s1215_s3 = sshll.u32 %s1857_s17, 4  ;;  %s1216_s3 = int_to_ptr.vmem [resolvable:$true] %s1215_s3 }
 0x732   :  { %1703 = vrcp.f32 %v1161_v52  ;;  %s1815_s18 = scalar_lea.vmem %s1216_s3, 1024  ;;  %p1820_p13 = scmp.lt.s32.totalorder %s1216_s3, %s1216_s3 }
 0x733   :  { %p1816_p12 = scmp.ne.s32.totalorder %s1216_s3, %s1815_s18  ;;  %p1821_p0 = scmp.lt.s32.totalorder %s1815_s18, %s1815_s18 }
 0x735   :  { %p1822_p1 = por %p1821_p0, %p1820_p13 }
 0x737   :  { %p1823_p2 = pnand %p1822_p1, %p1816_p12 }
 0x73c   :  { %v1704_v57 = vpop.eup %1703 }
 0x73d   :  { %1185 = vst [vmem:[#allocation12 + $0x38] sm:$0xff] %v1704_v57 }
 0x73e   :  { %1826 = shalt.err (!%p1823_p2)
}
 0x73f   :  { %s1827_s22 = scalar_lea.hbm %s2135_s7, 1024 }
 0x740   :  { %p1828_p3 = scmp.ne.s32.totalorder %s2135_s7, %s1827_s22  ;;  %p1831_p4 = scmp.lt.u32.totalorder %s1827_s22, %s2135_s7 }
 0x742   :  { %p1833_p5 = pnand %p1831_p4, %p1828_p3 }
 0x744   :  { %1836 = shalt.err (!%p1833_p5)
}
 0x745   :  { %1221 = dma.vmem_to_hbm [thread:$0]  %s1216_s3, 1024, %s2135_s7, [#allocation11], %s1855_s29, %s1855_s29, %s1856_s30  }
 0x746   :  { %1841 = dma.done.wait [#allocation5], 512  }
 0x747   :  { %1842 = vsyncadd [#allocation5], 4294966784 }
 0x748   :  { %1843 = dma.done.wait [#allocation11], 2048  }
 0x749   :  { %1844 = vsyncadd [#allocation11], 4294965248 }
 0x74a   :  { %1231 = vsyncpa [#allocation4], 1 }
 0x74b   :  { %1232 = vsyncpa [#allocation7], 1 }
 0x74c   :  { %1233 = vsyncpa [#allocation5], 1 }
 0x74d   :  { %1234 = vsyncpa [#allocation11], 1 }

</bundles_post_ra>
